<compile_context>
chip_gen: v5e
topology: v5e:2x2
jax: 0.10.0
libtpu: 0.0.40
codegen_flags: <defaults>
</compile_context>

<pallas_src>
import jax
import jax.numpy as jnp
from jax.experimental import pallas as pl
from jax.experimental.pallas import tpu as pltpu

_LANES = 128                 # f32 vreg lane width
_SUBLANES = 8                # f32 vreg sublane count
_DEFAULT_BLOCK_ROWS = 512    # 512 x 128 x 4 B = 256 KiB per input tile


def _linreg_kernel(coeff_ref, x0_ref, x1_ref, o_ref):
    """Fully-folded affine model in lane-dense elementwise form.

    coeff_ref: (3,) f32 in SMEM: [c0, c1, c_bias]
    x0_ref:    (BLOCK_ROWS, 128) feature-0 slab
    x1_ref:    (BLOCK_ROWS, 128) feature-1 slab
    o_ref:     (BLOCK_ROWS, 128) prediction slab
    """
    c0 = coeff_ref[0]
    c1 = coeff_ref[1]
    cb = coeff_ref[2]
    # 2 muls + 2 adds per element; memory-bound, full-lane unmasked stores.
    o_ref[...] = x0_ref[...] * c0 + x1_ref[...] * c1 + cb


def linear_regression_forward(x, params, *, block_rows=_DEFAULT_BLOCK_ROWS):
    """Eval-mode forward of LinearRegressionModel. x: (N, 2). Returns (N, 1) f32."""
    N, F = x.shape
    assert F == 2, F
    eps = 1e-5

    # ---- Fold BN(eval) affine + Linear(2,1) + target denormalization into
    # ---- y = c0*x0 + c1*x1 + c_bias  (plain-JAX glue, runs once per call).
    bn_scale = params["bn_gamma"] / jnp.sqrt(params["bn_running_var"] + eps)   # (2,)
    bn_shift = params["bn_beta"] - params["bn_running_mean"] * bn_scale        # (2,)
    w = params["linear_w"].reshape(F)                                          # (2,)
    b = params["linear_b"].reshape(())
    y_std = params["y_std"].reshape(())
    y_mean = params["y_mean"].reshape(())
    c_feat = y_std * w * bn_scale                                              # (2,)
    c_bias = y_std * (jnp.sum(w * bn_shift) + b) + y_mean                      # ()
    coeffs = jnp.concatenate([c_feat, c_bias[None]]).astype(jnp.float32)       # (3,)

    # ---- Lane-dense layout: each feature column -> (rows, 128) slab.
    x = x.astype(jnp.float32)
    rows = pl.cdiv(N, _LANES)
    rows = pl.cdiv(rows, _SUBLANES) * _SUBLANES          # sublane-aligned
    block_rows = min(block_rows, rows)                   # shrink for tiny N
    rows = pl.cdiv(rows, block_rows) * block_rows        # whole number of blocks
    n_pad = rows * _LANES
    pad = n_pad - N
    x0 = jnp.pad(x[:, 0], (0, pad)).reshape(rows, _LANES)
    x1 = jnp.pad(x[:, 1], (0, pad)).reshape(rows, _LANES)

    col_spec = pl.BlockSpec((block_rows, _LANES), lambda i: (i, 0))

    out_pad = pl.pallas_call(
        _linreg_kernel,
        out_shape=jax.ShapeDtypeStruct((rows, _LANES), jnp.float32),
        grid=(rows // block_rows,),
        in_specs=[
            pl.BlockSpec(memory_space=pltpu.MemorySpace.SMEM),   # coeffs (3,)
            col_spec,                                            # x0 slab
            col_spec,                                            # x1 slab
        ],
        out_specs=col_spec,
        compiler_params=pltpu.CompilerParams(
            dimension_semantics=("parallel",)),
    )(coeffs, x0, x1)

    # Undo the lane-dense packing: back to (N, 1).
    return out_pad.reshape(n_pad)[:N].reshape(N, 1)


def make_params():
    """Deterministic synthetic parameters matching the module's __init__ shapes."""
    k = jax.random.PRNGKey(0)
    k_w, k_b = jax.random.split(k)
    return {
        # torch.nn.Linear(2, 1)
        "linear_w": jax.random.uniform(k_w, (1, 2), jnp.float32, -0.7, 0.7),
        "linear_b": jax.random.uniform(k_b, (1,), jnp.float32, -0.7, 0.7),
        # torch.nn.BatchNorm1d(2)  (eval-mode running statistics + affine)
        "bn_gamma": jnp.array([1.1, 0.9], jnp.float32),
        "bn_beta": jnp.array([0.05, -0.05], jnp.float32),
        "bn_running_mean": jnp.array([0.3, -0.2], jnp.float32),
        "bn_running_var": jnp.array([1.5, 0.8], jnp.float32),
        # registered buffers for target denormalization
        "y_mean": jnp.array([42.0], jnp.float32),
        "y_std": jnp.array([7.5], jnp.float32),
    }


def reference_forward(x, params):
    """Pure-JAX reference of the PyTorch eval forward."""
    eps = 1e-5
    xn = (x - params["bn_running_mean"]) / jnp.sqrt(params["bn_running_var"] + eps)
    xn = xn * params["bn_gamma"] + params["bn_beta"]
    out = xn @ params["linear_w"].T + params["linear_b"]
    return out * params["y_std"] + params["y_mean"]


# TODO(synk): BatchNorm1d training-mode batch-statistics update is not
# implemented; this kernel covers the eval/deployment path (running stats).

if __name__ == "__main__":
    params = make_params()

    # Primary small-shape check, matching the module's (batch, 2) input.
    x = jax.random.normal(jax.random.PRNGKey(0), (8, 2), jnp.float32)
    out = jax.block_until_ready(linear_regression_forward(x, params))
    ref = reference_forward(x, params)
    assert out.shape == (8, 1), out.shape
    assert jnp.allclose(out, ref, atol=1e-4, rtol=1e-5), (out, ref)

    # Exercise the padding / lane-slab path with N not a multiple of 128.
    x2 = jax.random.normal(jax.random.PRNGKey(1), (1000, 2), jnp.float32)
    out2 = jax.block_until_ready(linear_regression_forward(x2, params))
    ref2 = reference_forward(x2, params)
    assert out2.shape == (1000, 1), out2.shape
    assert jnp.allclose(out2, ref2, atol=1e-4, rtol=1e-5), "mismatch at N=1000"

    print("KERNEL_OK")
</pallas_src>

<mosaic_0001>
module attributes {stable_mosaic.version = 11 : i64} {
  func.func @_linreg_kernel(%arg0: i32, %arg1: memref<3xf32, #tpu.memory_space<smem>>, %arg2: memref<8x128xf32, #tpu.memory_space<vmem>>, %arg3: memref<8x128xf32, #tpu.memory_space<vmem>>, %arg4: memref<8x128xf32, #tpu.memory_space<vmem>>) attributes {dimension_semantics = [#tpu.dimension_semantics<parallel>], iteration_bounds = array<i64: 1>, scalar_prefetch = 0 : i64, scratch_operands = 0 : i64, tpu.core_type = #tpu.core_type<tc>, window_params = [{transform_indices = @transform_0, window_bounds = array<i64: 3>}, {transform_indices = @transform_1, window_bounds = array<i64: 8, 128>}, {transform_indices = @transform_2, window_bounds = array<i64: 8, 128>}, {transform_indices = @transform_3, window_bounds = array<i64: 8, 128>}]} {
    %c0 = arith.constant 0 : index
    %0 = memref.load %arg1[%c0] : memref<3xf32, #tpu.memory_space<smem>>
    %c1 = arith.constant 1 : index
    %1 = memref.load %arg1[%c1] : memref<3xf32, #tpu.memory_space<smem>>
    %c2 = arith.constant 2 : index
    %2 = memref.load %arg1[%c2] : memref<3xf32, #tpu.memory_space<smem>>
    %c0_0 = arith.constant 0 : index
    %c0_1 = arith.constant 0 : index
    %3 = vector.load %arg2[%c0_0, %c0_1] : memref<8x128xf32, #tpu.memory_space<vmem>>, vector<8x128xf32>
    %4 = vector.broadcast %0 : f32 to vector<8x128xf32>
    %5 = arith.mulf %3, %4 : vector<8x128xf32>
    %c0_2 = arith.constant 0 : index
    %c0_3 = arith.constant 0 : index
    %6 = vector.load %arg3[%c0_2, %c0_3] : memref<8x128xf32, #tpu.memory_space<vmem>>, vector<8x128xf32>
    %7 = vector.broadcast %1 : f32 to vector<8x128xf32>
    %8 = arith.mulf %6, %7 : vector<8x128xf32>
    %9 = arith.addf %5, %8 : vector<8x128xf32>
    %10 = vector.broadcast %2 : f32 to vector<8x128xf32>
    %11 = arith.addf %9, %10 : vector<8x128xf32>
    %c0_4 = arith.constant 0 : index
    %c0_5 = arith.constant 0 : index
    %12 = vector.load %arg4[%c0_4, %c0_5] : memref<8x128xf32, #tpu.memory_space<vmem>>, vector<8x128xf32>
    tpu.vector_store %arg4[%c0_4, %c0_5], %11 {strides = array<i32>} : memref<8x128xf32, #tpu.memory_space<vmem>>, vector<8x128xf32>,
    return
  }
  func.func @transform_0(%arg0: i32) -> i32 {
    %c0_i32 = arith.constant 0 : i32
    %c0_i32_0 = arith.constant 0 : i32
    return %c0_i32 : i32
  }
  func.func @transform_1(%arg0: i32) -> (i32, i32) {
    %c0_i32 = arith.constant 0 : i32
    %c0_i32_0 = arith.constant 0 : i32
    return %arg0, %c0_i32 : i32, i32
  }
  func.func @transform_2(%arg0: i32) -> (i32, i32) {
    %c0_i32 = arith.constant 0 : i32
    %c0_i32_0 = arith.constant 0 : i32
    return %arg0, %c0_i32 : i32, i32
  }
  func.func @transform_3(%arg0: i32) -> (i32, i32) {
    %c0_i32 = arith.constant 0 : i32
    %c0_i32_0 = arith.constant 0 : i32
    return %arg0, %c0_i32 : i32, i32
  }
}

</mosaic_0001>

<bundles_post_ra>
// kernel: tpu_custom_call.1
= control target key start
LH: loop header
LB: loop body
LE: loop exit
PB: predicated region body
PF: predicated region fallthrough
CT: control target
= control target key end

     0   :  { %8 = vsyncpa [#allocation5], 0  ;;  %s222_s0 = inlined_call_operand.hbm [shape: f32[3], index: 0, kind: input, shape index: {}]   ;;  %s223_s1 = inlined_call_operand.hbm [shape: f32[8,128], index: 1, kind: input, shape index: {}]   ;;  %s224_s2 = inlined_call_operand.hbm [shape: f32[8,128], index: 2, kind: input, shape index: {}]   ;;  %s225_s3 = inlined_call_operand.hbm [shape: f32[8,128], index: 3, kind: output, shape index: {}]  }
   0x1   :  { %9 = vsyncpa [#allocation3], 0 }
   0x2   :  { %10 = vsyncpa [#allocation8], 0 }
   0x3   :  { %11 = vsyncpa [#allocation4], 0  ;;  %s17_s14 = sshll.u32 %s222_s0, 4  ;;  %s26_s17 = sshll.u32 %s223_s1, 4  ;;  %s18_s14 = int_to_ptr.hbm [resolvable:$true] %s17_s14  ;;  %s27_s17 = int_to_ptr.hbm [resolvable:$true] %s26_s17 }
   0x4   :  { %s186_s18 = smov [#allocation2]   ;;  %s187_s19 = smov [#allocation6]  }
   0x5   :  { %20 = dma.hbm_to_smem %s18_s14, 16, %s186_s18, [#allocation5]  }
   0x6   :  { %s28_s20 = sshll.u32 %s187_s19, 4  ;;  %s37_s23 = sshll.u32 %s224_s2, 4  ;;  %s29_s20 = int_to_ptr.vmem [resolvable:$true] %s28_s20  ;;  %s38_s23 = int_to_ptr.hbm [resolvable:$true] %s37_s23 }
   0x7   :  { %31 = dma.hbm_to_vmem [thread:$0]  %s27_s17, 128, %s29_s20, [#allocation3]  }
   0x8   :  { %s188_s24 = smov [#allocation7]  }
   0x9   :  { %s39_s25 = sshll.u32 %s188_s24, 4  ;;  %s40_s25 = int_to_ptr.vmem [resolvable:$true] %s39_s25 }
   0xa   :  { %42 = dma.hbm_to_vmem [thread:$0]  %s38_s23, 128, %s40_s25, [#allocation8]  }
   0xb   :  { %178 = dma.done.wait [#allocation5], 16  }
   0xc   :  { %179 = vsyncadd [#allocation5], 4294967280 }
   0xd   :  { %180 = dma.done.wait [#allocation3], 128  }
   0xe   :  { %181 = vsyncadd [#allocation3], 4294967168 }
   0xf   :  { %182 = dma.done.wait [#allocation8], 128  }
  0x10   :  { %183 = vsyncadd [#allocation8], 4294967168 }
  0x11   :  { %55 = sfence }
  0x12   :  { %s56_s0 = sld [smem:[#allocation2]]  ;;  %v59_v0 = vld [vmem:[#allocation6] sm:$0xff]  ;;  %v62_v1 = vld [vmem:[#allocation7] sm:$0xff]  ;;  %s189_s2 = smov [#allocation9]  }
  0x13   :  { %s88_s1 = sld [smem:[#allocation2 + $0x1]]  ;;  %s74_s27 = sshll.u32 %s189_s2, 4  ;;  %s75_s27 = int_to_ptr.vmem [resolvable:$true] %s74_s27 }
  0x14   :  { %s89_s26 = sld [smem:[#allocation2 + $0x2]]  ;;  %s76_s30 = sshll.u32 %s225_s3, 4  ;;  %s77_s30 = int_to_ptr.hbm [resolvable:$true] %s76_s30 }
  0x18   :  { %v60_v2 = vstv %s56_s0 }
  0x19   :  { %v61_v3 = vmul.f32 %v60_v2, %v59_v0  ;;  %v63_v4 = vstv %s88_s1 }
  0x1a   :  { %v64_v5 = vmul.f32 %v63_v4, %v62_v1  ;;  %v66_v6 = vstv %s89_s26 }
  0x1c   :  { %v65_v7 = vadd.f32 %v64_v5, %v61_v3 }
  0x1e   :  { %v67_v8 = vadd.f32 %v66_v6, %v65_v7 }
  0x20   :  { %68 = vst [vmem:[#allocation9] sm:$0xff] %v67_v8 }
  0x21   :  { %79 = dma.vmem_to_hbm [thread:$0]  %s75_s27, 128, %s77_s30, [#allocation4]  }
  0x22   :  { %184 = dma.done.wait [#allocation4], 128  }
  0x23   :  { %185 = vsyncadd [#allocation4], 4294967168 }
  0x24   :  { %84 = vsyncpa [#allocation3], 1 }
  0x25   :  { %85 = vsyncpa [#allocation8], 1 }
  0x26   :  { %86 = vsyncpa [#allocation4], 1 }
  0x27   :  { %87 = vsyncpa [#allocation5], 1 }

</bundles_post_ra>
